<compile_context>
chip_gen: v6e
topology: v6e:2x2x1
jax: 0.10.0
libtpu: 0.0.40
codegen_flags: <defaults>
</compile_context>

<pallas_src>
import jax
import jax.numpy as jnp
from jax.experimental import pallas as pl
from jax.experimental.pallas import tpu as pltpu


def _round_up(v, m):
    return ((v + m - 1) // m) * m


def mlp_head_kernel(x_ref, w1_ref, b1_ref, w2_ref, b2_ref, o_ref):
    # First GEMM: bf16 operands, f32 accumulation on the MXU.
    h = jnp.dot(x_ref[...], w1_ref[...], preferred_element_type=jnp.float32)
    h = jnp.maximum(h + b1_ref[...], 0.0)              # bias + ReLU (f32, VPU)

    # Second GEMM: cast activations to bf16 for the MXU, keep f32 accumulator.
    y = jnp.dot(h.astype(jnp.bfloat16), w2_ref[...],
                preferred_element_type=jnp.float32)
    y = y + b2_ref[...]

    # F.normalize(y, dim=1, p=2): y * rsqrt(max(sum(y^2), eps^2)).
    # Padded feature columns are exactly zero, so the reduction is unchanged.
    sq = jnp.sum(y * y, axis=-1, keepdims=True)
    inv_norm = jax.lax.rsqrt(jnp.maximum(sq, 1e-24))   # EUP rsqrt + VPU mul
    o_ref[...] = (y * inv_norm).astype(o_ref.dtype)


def mlp_head(x, w1, b1, w2, b2, *, tile_n=512):
    # x: (N, dim_in); w1: (dim_in, dim_h); b1: (1, dim_h);
    # w2: (dim_h, dim_feat); b2: (1, dim_feat).  Returns (N, dim_feat).
    n, dim_in = x.shape
    dim_h = w1.shape[1]
    dim_feat = w2.shape[1]

    # Lane-dense hidden axis: zero-pad dim_h to a multiple of 128.
    # ReLU(0 + 0) = 0 and the matching zero rows of w2 contribute nothing,
    # so the result is unchanged.
    h_p = _round_up(dim_h, 128)
    if h_p != dim_h:
        w1 = jnp.pad(w1, ((0, 0), (0, h_p - dim_h)))
        b1 = jnp.pad(b1, ((0, 0), (0, h_p - dim_h)))
        w2 = jnp.pad(w2, ((0, h_p - dim_h), (0, 0)))

    # Lane-dense output: zero-pad the feature axis to a multiple of 128.
    feat_p = _round_up(dim_feat, 128)
    if feat_p != dim_feat:
        w2 = jnp.pad(w2, ((0, 0), (0, feat_p - dim_feat)))
        b2 = jnp.pad(b2, ((0, 0), (0, feat_p - dim_feat)))

    # bf16 matmul operands (halves weight VMEM + x HBM traffic); biases f32.
    x_bf = x.astype(jnp.bfloat16)
    w1_bf = w1.astype(jnp.bfloat16)
    w2_bf = w2.astype(jnp.bfloat16)
    b1_f = b1.astype(jnp.float32)
    b2_f = b2.astype(jnp.float32)

    # Batch tile: 512 rows (multiple of 128 MXU rows) when batch is large,
    # otherwise the whole batch in one block.
    tn = n if n <= tile_n else tile_n
    grid = (pl.cdiv(n, tn),)

    # Scoped-VMEM budget: double-buffered x / output tiles, resident weights
    # and biases, plus f32 intermediates.  Clamp into a safe range
    # (v7x physical VMEM is 64 MiB per TC).
    out_bytes = jnp.dtype(x.dtype).itemsize
    vmem_bytes = (
        2 * tn * dim_in * 2          # x tiles (bf16, double buffered)
        + 2 * tn * feat_p * out_bytes  # output tiles (double buffered)
        + dim_in * h_p * 2           # w1 (bf16, resident)
        + h_p * feat_p * 2           # w2 (bf16, resident)
        + (h_p + feat_p) * 4         # biases (f32, resident)
        + tn * (h_p + feat_p) * 4    # f32 intermediates h, y
    )
    vmem_limit = int(min(max(int(vmem_bytes * 1.5), 32 << 20), 60 << 20))
    # TODO(synk): for very large dim_in/dim_h (weights not VMEM-resident even
    # at the 60 MiB cap), add a K-tiled inner loop for the first GEMM.

    out = pl.pallas_call(
        mlp_head_kernel,
        out_shape=jax.ShapeDtypeStruct((n, feat_p), x.dtype),
        grid_spec=pltpu.PrefetchScalarGridSpec(
            num_scalar_prefetch=0,
            grid=grid,
            in_specs=[
                pl.BlockSpec((tn, dim_in), lambda i: (i, 0)),   # streamed x
                pl.BlockSpec((dim_in, h_p), lambda i: (0, 0)),  # resident w1
                pl.BlockSpec((1, h_p), lambda i: (0, 0)),       # resident b1
                pl.BlockSpec((h_p, feat_p), lambda i: (0, 0)),  # resident w2
                pl.BlockSpec((1, feat_p), lambda i: (0, 0)),    # resident b2
            ],
            out_specs=pl.BlockSpec((tn, feat_p), lambda i: (i, 0)),
        ),
        compiler_params=pltpu.CompilerParams(
            dimension_semantics=("parallel",),
            vmem_limit_bytes=vmem_limit),
    )(x_bf, w1_bf, b1_f, w2_bf, b2_f)

    return out[:, :dim_feat]


def init_params(key, dim_in, dim_feat, dim_h=None, dtype=jnp.float32):
    # MLPHead.__init__: dim_h defaults to dim_in.
    if dim_h is None:
        dim_h = dim_in
    k1, k2, k3, k4 = jax.random.split(key, 4)
    w1 = jax.random.normal(k1, (dim_in, dim_h), dtype) * 0.05
    b1 = jax.random.normal(k2, (1, dim_h), dtype) * 0.05
    w2 = jax.random.normal(k3, (dim_h, dim_feat), dtype) * 0.05
    b2 = jax.random.normal(k4, (1, dim_feat), dtype) * 0.05
    return w1, b1, w2, b2


def mlp_head_ref(x, w1, b1, w2, b2):
    # Pure-JAX f32 reference of the PyTorch forward.
    h = jnp.maximum(x @ w1 + b1, 0.0)
    y = h @ w2 + b2
    norm = jnp.maximum(jnp.linalg.norm(y, axis=1, keepdims=True), 1e-12)
    return y / norm


if __name__ == "__main__":
    key = jax.random.PRNGKey(0)
    kx, kp = jax.random.split(key)

    batch, dim_in, dim_feat = 8, 32, 16
    x = jax.random.normal(kx, (batch, dim_in), jnp.float32)
    w1, b1, w2, b2 = init_params(kp, dim_in, dim_feat)

    out = mlp_head(x, w1, b1, w2, b2)
    out = jax.block_until_ready(out)

    ref = mlp_head_ref(x, w1, b1, w2, b2)
    assert out.shape == (batch, dim_feat)
    # bf16 MXU operands vs f32 reference -> loosened tolerance on the
    # normalized (unit-norm) outputs.
    assert jnp.allclose(out, ref, atol=2e-2, rtol=2e-2), "mismatch vs reference"

    print("KERNEL_OK")
</pallas_src>

<mosaic_0001>
module attributes {stable_mosaic.version = 11 : i64} {
  func.func @mlp_head_kernel(%arg0: i32, %arg1: memref<8x32xbf16, #tpu.memory_space<vmem>>, %arg2: memref<32x128xbf16, #tpu.memory_space<vmem>>, %arg3: memref<1x128xf32, #tpu.memory_space<vmem>>, %arg4: memref<128x128xbf16, #tpu.memory_space<vmem>>, %arg5: memref<1x128xf32, #tpu.memory_space<vmem>>, %arg6: memref<8x128xf32, #tpu.memory_space<vmem>>) attributes {dimension_semantics = [#tpu.dimension_semantics<parallel>], iteration_bounds = array<i64: 1>, scalar_prefetch = 0 : i64, scratch_operands = 0 : i64, tpu.core_type = #tpu.core_type<tc>, window_params = [{transform_indices = @transform_0, window_bounds = array<i64: 8, 32>}, {pipeline_mode = #tpu.pipeline_mode<synchronous>, transform_indices = @transform_1, window_bounds = array<i64: 32, 128>}, {pipeline_mode = #tpu.pipeline_mode<synchronous>, transform_indices = @transform_2, window_bounds = array<i64: 1, 128>}, {pipeline_mode = #tpu.pipeline_mode<synchronous>, transform_indices = @transform_3, window_bounds = array<i64: 128, 128>}, {pipeline_mode = #tpu.pipeline_mode<synchronous>, transform_indices = @transform_4, window_bounds = array<i64: 1, 128>}, {transform_indices = @transform_5, window_bounds = array<i64: 8, 128>}]} {
    %c0 = arith.constant 0 : index
    %c0_0 = arith.constant 0 : index
    %0 = vector.load %arg1[%c0, %c0_0] : memref<8x32xbf16, #tpu.memory_space<vmem>>, vector<8x32xbf16>
    %c0_1 = arith.constant 0 : index
    %c0_2 = arith.constant 0 : index
    %1 = vector.load %arg2[%c0_1, %c0_2] : memref<32x128xbf16, #tpu.memory_space<vmem>>, vector<32x128xbf16>
    %cst = arith.constant dense<0.000000e+00> : vector<8x128xf32>
    %2 = tpu.matmul %0, %1, %cst {dimension_numbers = #tpu.dot_dimension_numbers<[1], [0], [0], [1], [0, 0, 1, 1], [], []>} : vector<8x32xbf16>, vector<32x128xbf16>, vector<8x128xf32> -> vector<8x128xf32>
    %c0_3 = arith.constant 0 : index
    %c0_4 = arith.constant 0 : index
    %3 = vector.load %arg3[%c0_3, %c0_4] : memref<1x128xf32, #tpu.memory_space<vmem>>, vector<1x128xf32>
    %4 = vector.broadcast %3 : vector<1x128xf32> to vector<8x128xf32>
    %5 = arith.addf %2, %4 : vector<8x128xf32>
    %cst_5 = arith.constant 0.000000e+00 : f32
    %6 = vector.broadcast %cst_5 : f32 to vector<8x128xf32>
    %7 = arith.maximumf %5, %6 : vector<8x128xf32>
    %8 = arith.truncf %7 : vector<8x128xf32> to vector<8x128xbf16>
    %c0_6 = arith.constant 0 : index
    %c0_7 = arith.constant 0 : index
    %9 = vector.load %arg4[%c0_6, %c0_7] : memref<128x128xbf16, #tpu.memory_space<vmem>>, vector<128x128xbf16>
    %cst_8 = arith.constant dense<0.000000e+00> : vector<8x128xf32>
    %10 = tpu.matmul %8, %9, %cst_8 {dimension_numbers = #tpu.dot_dimension_numbers<[1], [0], [0], [1], [0, 0, 1, 1], [], []>} : vector<8x128xbf16>, vector<128x128xbf16>, vector<8x128xf32> -> vector<8x128xf32>
    %c0_9 = arith.constant 0 : index
    %c0_10 = arith.constant 0 : index
    %11 = vector.load %arg5[%c0_9, %c0_10] : memref<1x128xf32, #tpu.memory_space<vmem>>, vector<1x128xf32>
    %12 = vector.broadcast %11 : vector<1x128xf32> to vector<8x128xf32>
    %13 = arith.addf %10, %12 : vector<8x128xf32>
    %14 = arith.mulf %13, %13 : vector<8x128xf32>
    %cst_11 = arith.constant dense<0.000000e+00> : vector<8xf32>
    %15 = vector.multi_reduction <add>, %14, %cst_11 [1] : vector<8x128xf32> to vector<8xf32>
    %16 = vector.shape_cast %15 : vector<8xf32> to vector<8x1xf32>
    %cst_12 = arith.constant 1.000000e-24 : f32
    %17 = vector.broadcast %cst_12 : f32 to vector<8x1xf32>
    %18 = arith.maximumf %16, %17 : vector<8x1xf32>
    %19 = math.rsqrt %18 : vector<8x1xf32>
    %20 = vector.broadcast %19 : vector<8x1xf32> to vector<8x128xf32>
    %21 = arith.mulf %13, %20 : vector<8x128xf32>
    %c0_13 = arith.constant 0 : index
    %c0_14 = arith.constant 0 : index
    %22 = vector.load %arg6[%c0_13, %c0_14] : memref<8x128xf32, #tpu.memory_space<vmem>>, vector<8x128xf32>
    tpu.vector_store %arg6[%c0_13, %c0_14], %21 {strides = array<i32>} : memref<8x128xf32, #tpu.memory_space<vmem>>, vector<8x128xf32>,
    return
  }
  func.func @transform_0(%arg0: i32) -> (i32, i32) {
    %c0_i32 = arith.constant 0 : i32
    %c0_i32_0 = arith.constant 0 : i32
    return %arg0, %c0_i32 : i32, i32
  }
  func.func @transform_1(%arg0: i32) -> (i32, i32) {
    %c0_i32 = arith.constant 0 : i32
    %c0_i32_0 = arith.constant 0 : i32
    %c0_i32_1 = arith.constant 0 : i32
    return %c0_i32, %c0_i32_0 : i32, i32
  }
  func.func @transform_2(%arg0: i32) -> (i32, i32) {
    %c0_i32 = arith.constant 0 : i32
    %c0_i32_0 = arith.constant 0 : i32
    %c0_i32_1 = arith.constant 0 : i32
    return %c0_i32, %c0_i32_0 : i32, i32
  }
  func.func @transform_3(%arg0: i32) -> (i32, i32) {
    %c0_i32 = arith.constant 0 : i32
    %c0_i32_0 = arith.constant 0 : i32
    %c0_i32_1 = arith.constant 0 : i32
    return %c0_i32, %c0_i32_0 : i32, i32
  }
  func.func @transform_4(%arg0: i32) -> (i32, i32) {
    %c0_i32 = arith.constant 0 : i32
    %c0_i32_0 = arith.constant 0 : i32
    %c0_i32_1 = arith.constant 0 : i32
    return %c0_i32, %c0_i32_0 : i32, i32
  }
  func.func @transform_5(%arg0: i32) -> (i32, i32) {
    %c0_i32 = arith.constant 0 : i32
    %c0_i32_0 = arith.constant 0 : i32
    return %arg0, %c0_i32 : i32, i32
  }
}

</mosaic_0001>

<bundles_post_ra>
// kernel: tpu_custom_call.1
= control target key start
LH: loop header
LB: loop body
LE: loop exit
PB: predicated region body
PF: predicated region fallthrough
CT: control target
= control target key end

     0   :  { %10 = vsyncpa [#allocation3], 0  ;;  %s480_s0 = inlined_call_operand.hbm [shape: bf16[8,32], index: 0, kind: input, shape index: {}]   ;;  %s481_s1 = inlined_call_operand.hbm [shape: bf16[32,128], index: 1, kind: input, shape index: {}]   ;;  %s482_s2 = inlined_call_operand.vmem [shape: f32[1,128], index: 2, kind: input, shape index: {}]   ;;  %s483_s3 = inlined_call_operand.hbm [shape: bf16[128,128], index: 3, kind: input, shape index: {}]   ;;  %s484_s4 = inlined_call_operand.vmem [shape: f32[1,128], index: 4, kind: input, shape index: {}]   ;;  %s485_s5 = inlined_call_operand.hbm [shape: f32[8,128], index: 5, kind: output, shape index: {}]  }
   0x1   :  { %11 = vsyncpa [#allocation6], 0 }
   0x2   :  { %12 = vsyncpa [#allocation4], 0  ;;  %s424_s18 = smov [#allocation5]  }
   0x3   :  { %s28_s19 = sshll.u32 %s424_s18, 4  ;;  %s29_s19 = int_to_ptr.vmem [resolvable:$true] %s28_s19 }
   0x4   :  { %s346_s20 = scalar_lea.vmem %s29_s19, 256  ;;  %p351_p1 = scmp.lt.s32.totalorder %s29_s19, %s29_s19 }
   0x5   :  { %p347_p0 = scmp.ne.s32.totalorder %s29_s19, %s346_s20  ;;  %p352_p2 = scmp.lt.s32.totalorder %s346_s20, %s346_s20 }
   0x7   :  { %p353_p3 = por %p352_p2, %p351_p1 }
   0x9   :  { %p354_p4 = pnand %p353_p3, %p347_p0 }
   0xb   :  { %357 = shalt.err (!%p354_p4)
}
   0xc   :  { %s425_s21 = smov 64   ;;  %s426_s22 = smov 4  }
   0xd   :  { %34 = dma.hbm_to_vmem [thread:$0]  %s481_s1, 256, %s29_s19, [#allocation6], %s425_s21, %s425_s21, %s426_s22  }
   0xe   :  { %s427_s25 = smov [#allocation2]   ;;  %s428_s27 = smov [#allocation7]  }
   0xf   :  { %s19_s26 = sshll.u32 %s427_s25, 4  ;;  %s42_s28 = sshll.u32 %s428_s27, 4  ;;  %s20_s26 = int_to_ptr.vmem [resolvable:$true] %s19_s26  ;;  %s43_s28 = int_to_ptr.vmem [resolvable:$true] %s42_s28 }
  0x10   :  { %s366_s29 = scalar_lea.vmem %s20_s26, 64  ;;  %p371_p6 = scmp.lt.s32.totalorder %s20_s26, %s20_s26 }
  0x11   :  { %p367_p5 = scmp.ne.s32.totalorder %s20_s26, %s366_s29  ;;  %p372_p7 = scmp.lt.s32.totalorder %s366_s29, %s366_s29 }
  0x13   :  { %p373_p8 = por %p372_p7, %p371_p6 }
  0x15   :  { %p374_p9 = pnand %p373_p8, %p367_p5 }
  0x17   :  { %377 = shalt.err (!%p374_p9)
}
  0x18   :  { %22 = dma.hbm_to_vmem [thread:$0]  %s480_s0, 64, %s20_s26, [#allocation3]  }
  0x19   :  { %s386_s7 = scalar_lea.vmem %s43_s28, 1024  ;;  %p391_p11 = scmp.lt.s32.totalorder %s43_s28, %s43_s28 }
  0x1a   :  { %p387_p10 = scmp.ne.s32.totalorder %s43_s28, %s386_s7  ;;  %p392_p12 = scmp.lt.s32.totalorder %s386_s7, %s386_s7 }
  0x1c   :  { %p393_p13 = por %p392_p12, %p391_p11 }
  0x1e   :  { %p394_p0 = pnand %p393_p13, %p387_p10 }
  0x20   :  { %397 = shalt.err (!%p394_p0)
}
  0x21   :  { %48 = dma.hbm_to_vmem [thread:$0]  %s483_s3, 1024, %s43_s28, [#allocation6], %s425_s21, %s425_s21, %s426_s22  }
  0x22   :  { %418 = dma.done.wait [#allocation3], 64  }
  0x23   :  { %419 = vsyncadd [#allocation3], 4294967232 }
  0x24   :  { %420 = dma.done.wait [#allocation6], 1280  }
  0x25   :  { %421 = vsyncadd [#allocation6], 4294966016  ;;  %v429_v0 = vmov 0.0   ;;  %vm430_vm0 = vmmov 0   ;;  %v326_v1 = vld [vmem:[#allocation5 + $0x8] sm:$0xff]   ;;  %v327_v2 = vld [vmem:[#allocation5] sm:$0xff]  }
  0x26   :  { %290 = vmatprep.subr.bf16.mxu0 %v429_v0  ;;  %294 = vmatprep.mubr.msk.bf16.mxu0 %vm430_vm0, %v429_v0  ;;  %v328_v3 = vld [vmem:[#allocation7 + $0x38] sm:$0xff]   ;;  %vm85_vm1 = vcmask 261120   ;;  %v329_v4 = vld [vmem:[#allocation7 + $0x30] sm:$0xff]   ;;  %v61_v5 = vld [vmem:[#allocation2] sm:$0xf] }
  0x27   :  { %298 = vmatprep.subr.bf16.mxu1 %v429_v0  ;;  %314 = vmatprep.mubr.msk.bf16.mxu1 %vm430_vm0, %v429_v0  ;;  %v330_v6 = vld [vmem:[#allocation7 + $0x28] sm:$0xff]   ;;  %v331_v7 = vld [vmem:[#allocation7 + $0x20] sm:$0xff]   ;;  %v332_v8 = vld [vmem:[#allocation7 + $0x18] sm:$0xff]  }
  0x28   :  { %291 = vmatpush3.bf16.msra.mxu0 %v326_v1  ;;  %299 = vmatpush3.bf16.msra.mxu1 %v328_v3  ;;  %v333_v9 = vld [vmem:[#allocation7 + $0x10] sm:$0xff]   ;;  %v334_v10 = vld [vmem:[#allocation7 + $0x8] sm:$0xff]   ;;  %v335_v11 = vld [vmem:[#allocation7] sm:$0xff]  }
  0x29   :  { %292 = vmatprep.subr.bf16.mxu0 %v429_v0  ;;  %300 = vmatprep.subr.bf16.mxu1 %v429_v0  ;;  %v265_v12 = vld [vmem:[%s482_s2] ss:$0 sm:$0xff]  ;;  %s431_s2 = smov [#allocation8]  }
  0x2a   :  { %v269_v20 = vld [vmem:[%s484_s4] ss:$0 sm:$0xff]  ;;  %s255_s11 = sshll.u32 %s431_s2, 4  ;;  %s256_s11 = int_to_ptr.vmem [resolvable:$true] %s255_s11 }
  0x2b   :  { %s398_s12 = scalar_lea.vmem %s256_s11, 128  ;;  %p403_p2 = scmp.lt.s32.totalorder %s256_s11, %s256_s11 }
  0x2c   :  { %293 = vmatpush3.bf16.msra.mxu0 %v327_v2  ;;  %301 = vmatpush3.bf16.msra.mxu1 %v329_v4  ;;  %p399_p1 = scmp.ne.s32.totalorder %s256_s11, %s398_s12  ;;  %p404_p3 = scmp.lt.s32.totalorder %s398_s12, %s398_s12 }
  0x2d   :  { %302 = vmatprep.subr.bf16.mxu1 %v429_v0 }
  0x2e   :  { %p405_p4 = por %p404_p3, %p403_p2 }
  0x2f   :  { %295 = vmatmul.mubr.msk.bf16.vlgmr.msra.gmra.mxu0 %vm85_vm1, %v61_v5 }
  0x30   :  { %303 = vmatpush3.bf16.msra.mxu1 %v330_v6  ;;  %p406_p5 = pnand %p405_p4, %p399_p1 }
  0x31   :  { %304 = vmatprep.subr.bf16.mxu1 %v429_v0 }
  0x34   :  { %305 = vmatpush3.bf16.msra.mxu1 %v331_v7 }
  0x35   :  { %306 = vmatprep.subr.bf16.mxu1 %v429_v0 }
  0x38   :  { %307 = vmatpush3.bf16.msra.mxu1 %v332_v8 }
  0x39   :  { %308 = vmatprep.subr.bf16.mxu1 %v429_v0 }
  0x3c   :  { %309 = vmatpush3.bf16.msra.mxu1 %v333_v9 }
  0x3d   :  { %310 = vmatprep.subr.bf16.mxu1 %v429_v0 }
  0x40   :  { %311 = vmatpush3.bf16.msra.mxu1 %v334_v10 }
  0x41   :  { %312 = vmatprep.subr.bf16.mxu1 %v429_v0 }
  0x44   :  { %313 = vmatpush3.bf16.msra.mxu1 %v335_v11 }
  0xef   :  { %v123_v13 = vpop.f32.mrf.mxu0 }
  0xf0   :  { %v124_v14 = vadd.f32 %v265_v12, %v123_v13 }
  0xf1   :  { %v296_v15 = vpop.f32.mrf.mxu0 }
  0xf2   :  { %v129_v16 = vmax.f32 %v124_v14, 0.0 }
  0xf3   :  { %v126_v17 = vpop.f32.mrf.mxu0 }
  0xf4   :  { %v130_v18 = vpack.c.bf16 %v129_v16, %v129_v16 }
  0xf5   :  { %v297_v19 = vpop.f32.mrf.mxu0 }
  0xf6   :  { %315 = vmatmul.mubr.bf16.vlgmr.msra.gmra.mxu1 %v130_v18 }
 0x1b6   :  { %v236_v21 = vpop.f32.mrf.mxu1 }
 0x1b7   :  { %v237_v22 = vadd.f32 %v269_v20, %v236_v21 }
 0x1b8   :  { %v316_v23 = vpop.f32.mrf.mxu1 }
 0x1b9   :  { %v242_v24 = vmul.f32 %v237_v22, %v237_v22 }
 0x1ba   :  { %v239_v25 = vpop.f32.mrf.mxu1 }
 0x1bb   :  { %243 = vadd.xlane.f32.xlu0 %v242_v24 }
 0x1bc   :  { %v317_v26 = vpop.f32.mrf.mxu1 }
 0x244   :  { %v244_v27 = vpop.xlane.xlu0 %243 }
 0x245   :  { %v245_v28 = vmax.f32 %v244_v27, 1e-24 }
 0x247   :  { %336 = vrsqrt.f32 %v245_v28 }
 0x254   :  { %v337_v29 = vpop.eup %336 }
 0x255   :  { %v247_v30 = vmul.f32 %v337_v29, %v237_v22 }
 0x257   :  { %248 = vst [vmem:[#allocation8] sm:$0xff] %v247_v30 }
 0x258   :  { %409 = shalt.err (!%p406_p5)
}
 0x259   :  { %258 = dma.vmem_to_hbm [thread:$0]  %s256_s11, 128, %s485_s5, [#allocation4]  }
 0x25a   :  { %422 = dma.done.wait [#allocation4], 128  }
 0x25b   :  { %423 = vsyncadd [#allocation4], 4294967168 }
 0x25c   :  { %262 = vsyncpa [#allocation3], 1 }
 0x25d   :  { %263 = vsyncpa [#allocation6], 1 }
 0x25e   :  { %264 = vsyncpa [#allocation4], 1 }

</bundles_post_ra>
